<compile_context>
chip_gen: v7x
topology: tpu7x:2x2x1
jax: 0.10.0
libtpu: 0.0.40
codegen_flags: <defaults>
</compile_context>

<pallas_src>
import functools
import math

import jax
import jax.numpy as jnp
from jax.experimental import pallas as pl
from jax.experimental.pallas import tpu as pltpu


def _fusion_kernel(x_ref, tmat_ref, g_ref, w_ref, b_ref, y_ref, rflat_ref, *, feat):
    x = x_ref[...]                                             # (TN, F) f32
    cd = tmat_ref.dtype                                        # MXU compute dtype

    # R_flat[n, i*F + j] = tanh( sum_a x[n,a] * T[i,a,j] )
    acc = jnp.dot(x.astype(cd), tmat_ref[...],
                  preferred_element_type=jnp.float32)          # (TN, F*F) f32
    # tanh in the R output dtype: bf16 on the fast path uses the bf16 EUP rate
    # (v6e/v7x) and halves the dominant R HBM writeback.
    r_flat = jnp.tanh(acc.astype(rflat_ref.dtype))             # (TN, F*F)
    rflat_ref[...] = r_flat

    # x_tile[n, i*F + j] = x[n, j]   (F lane-concats; negligible at F=32)
    x_tile = jnp.tile(x.astype(cd), (1, feat))                 # (TN, F*F) cd

    # s[n, i] = sum_j x[n,j] * R[n,i,j]  -- grouped lane reduction on the MXU
    # against the resident G (G[k, i] = (k // F == i), built once on the host).
    prod = r_flat.astype(cd) * x_tile                          # (TN, F*F) cd
    s = jnp.dot(prod, g_ref[...],
                preferred_element_type=jnp.float32)            # (TN, F) f32
    xir = x * s                                                # (TN, F) f32

    # fused linear on [x, xir]: one K=2F MXU push instead of two K=F ones
    xc = jnp.concatenate([x, xir], axis=1)                     # (TN, 2F) f32
    y = jnp.dot(xc, w_ref[...],
                preferred_element_type=jnp.float32) + b_ref[...]   # (TN, O)

    # ELU (alpha = 1.0).  expm1(y) == tanh(y/2) * (exp(y) + 1): full expm1
    # accuracy near 0 (no exp(y)-1 cancellation) using only exp/tanh.
    neg = jnp.tanh(0.5 * y) * (jnp.exp(y) + 1.0)
    y_ref[...] = jnp.where(y > 0, y, neg).astype(y_ref.dtype)


def prepare_tensor_fusion_params(T_tensor, fc_w, fc_b, compute_dtype=jnp.bfloat16):
    """One-time parameter preprocessing (hoisted out of the per-call path)."""
    F = T_tensor.shape[0]
    # torch:  T.transpose(0,1).reshape(F, F*F)  ->  tmat[a, i*F + j] = T[i,a,j]
    tmat = jnp.transpose(T_tensor, (1, 0, 2)).reshape(F, F * F).astype(compute_dtype)
    # group-sum matrix G[k, i] = (k // F == i): built ONCE here, resident in VMEM
    g = (jnp.arange(F * F)[:, None] // F ==
         jnp.arange(F)[None, :]).astype(compute_dtype)              # (F*F, F)
    w_cat = fc_w.T.astype(jnp.float32)                              # (2F, O)
    b = fc_b.reshape(1, -1).astype(jnp.float32)                     # (1, O)
    return tmat, g, w_cat, b


def _pick_block_n(n, feat, out_features, r_bytes, cd_bytes,
                  vmem_block_budget=12 * 1024 * 1024, max_block=1024):
    """VMEM-aware batch-tile pick.

    Per-row VMEM ~ F*F * (f32 acc + double-buffered R out + live R + two cd
    intermediates).  block_n is a multiple of 8 (16 when R is bf16, to keep
    (16,128)-packed stores unmasked) and is capped at N/2 so the 'parallel'
    batch axis always has >= 2 steps for v7x's two TensorCores.
    """
    base = 16 if r_bytes < 4 else 8
    per_row = feat * feat * (4 + 3 * r_bytes + 2 * cd_bytes) \
        + 8 * (feat + out_features)
    bn = min(max_block, max(base, vmem_block_budget // per_row))
    bn = min(bn, ((n + base - 1) // base) * base)     # never bigger than padded N
    if n >= 2 * base:
        bn = min(bn, n // 2)                          # >= 2 grid steps (v7x TCs)
    bn -= bn % base
    return max(bn, base)


def tensor_fusion_forward(x, tmat, g, w_cat, b, *, r_dtype=None, block_n=None):
    """Pallas implementation of TensorFusionLayer.forward (eval mode)."""
    N, F = x.shape
    O = w_cat.shape[1]
    assert tmat.shape == (F, F * F) and g.shape == (F * F, F)
    assert w_cat.shape == (2 * F, O) and b.shape == (1, O)

    r_dtype = x.dtype if r_dtype is None else r_dtype
    r_bytes = jnp.dtype(r_dtype).itemsize
    cd_bytes = jnp.dtype(tmat.dtype).itemsize

    if block_n is None:
        block_n = _pick_block_n(N, F, O, r_bytes, cd_bytes)

    # Ragged batch: cdiv grid + zero-pad, outputs sliced back below.
    grid_n = pl.cdiv(N, block_n)
    n_pad = grid_n * block_n
    x_p = x if n_pad == N else jnp.pad(x, ((0, n_pad - N), (0, 0)))

    kernel = functools.partial(_fusion_kernel, feat=F)

    # Advisory cost hint: FLOPs wildly understate the HBM/EUP cost of this kernel.
    flops = (2 * n_pad * F * (F * F)        # x @ T_mat
             + 2 * n_pad * (F * F) * F      # grouped reduction matmul
             + 2 * n_pad * (2 * F) * O      # fc
             + 4 * n_pad * F * F)           # elementwise
    cost = pl.CostEstimate(
        flops=int(flops),
        transcendentals=int(n_pad * F * F + n_pad * O),
        bytes_accessed=int(n_pad * F * 4 + n_pad * F * F * r_bytes
                           + n_pad * O * 4 + 2 * F * F * F * cd_bytes
                           + 2 * F * O * 4),
    )

    # VMEM estimate: per-block work + (double-buffered) resident params, + headroom.
    est_vmem = (block_n * (F * F * (4 + 3 * r_bytes + 2 * cd_bytes)
                           + 4 * (2 * F + 2 * O))
                + 2 * (2 * F * F * F * cd_bytes + 2 * F * O * 4 + O * 4))
    vmem_limit = int(min(56 * 2**20, max(32 * 2**20, est_vmem * 3 // 2)))

    y, r_flat = pl.pallas_call(
        kernel,
        grid=(grid_n,),
        in_specs=[
            pl.BlockSpec((block_n, F), lambda i: (i, 0)),       # x (tiled over N)
            pl.BlockSpec((F, F * F), lambda i: (0, 0)),         # tmat  (resident)
            pl.BlockSpec((F * F, F), lambda i: (0, 0)),         # G     (resident)
            pl.BlockSpec((2 * F, O), lambda i: (0, 0)),         # fc weight slab
            pl.BlockSpec((1, O), lambda i: (0, 0)),             # fc bias
        ],
        out_specs=[
            pl.BlockSpec((block_n, O), lambda i: (i, 0)),       # y
            pl.BlockSpec((block_n, F * F), lambda i: (i, 0)),   # R flat (lane-dense)
        ],
        out_shape=[
            jax.ShapeDtypeStruct((n_pad, O), x.dtype),
            jax.ShapeDtypeStruct((n_pad, F * F), r_dtype),
        ],
        compiler_params=pltpu.CompilerParams(
            dimension_semantics=("parallel",),
            vmem_limit_bytes=vmem_limit),
        cost_estimate=cost,
    )(x_p, tmat, g, w_cat, b)

    y = y[:N]
    R = r_flat[:N].reshape(N, F, F)   # free row-major reshape back to (N, F, F)
    return y, R


def tensor_fusion_ref(x, T_tensor, fc_w, fc_b):
    """Pure-JAX reference mirroring the torch forward (eval mode)."""
    N, F = x.shape
    x_inter = x[:, :, None] * x[:, None, :]                               # (N,F,F)
    R = jnp.tanh(
        (x @ jnp.transpose(T_tensor, (1, 0, 2)).reshape(F, F * F)).reshape(N, F, F)
    )
    xir = (x_inter * R).sum(2)                                            # (N,F)
    y = jnp.concatenate([x, xir], axis=1) @ fc_w.T + fc_b
    y = jnp.where(y > 0, y, jnp.expm1(y))
    return y, R


if __name__ == "__main__":
    # Small shapes consistent with the module: batch=64, in_features=32, out=16.
    N, F, O = 64, 32, 16
    key = jax.random.PRNGKey(0)
    kx, kt, kw, kb = jax.random.split(key, 4)

    x = jax.random.normal(kx, (N, F), dtype=jnp.float32)

    # Deterministic parameter init (same shapes as the torch module).
    bound_t = math.sqrt(6.0 / (2.0 * F * F))        # xavier_uniform on (F,F,F)
    T_tensor = jax.random.uniform(kt, (F, F, F), jnp.float32, -bound_t, bound_t)
    bound_w = 1.0 / math.sqrt(2 * F)                # nn.Linear(2F -> O) init
    fc_w = jax.random.uniform(kw, (O, 2 * F), jnp.float32, -bound_w, bound_w)
    fc_b = jax.random.uniform(kb, (O,), jnp.float32, -bound_w, bound_w)

    y_ref, R_ref = tensor_fusion_ref(x, T_tensor, fc_w, fc_b)

    # --- exact path: f32 operands, f32 R, auto (VMEM-aware) batch tile -------
    params_f32 = prepare_tensor_fusion_params(T_tensor, fc_w, fc_b, jnp.float32)
    y32, R32 = tensor_fusion_forward(x, *params_f32)
    jax.block_until_ready((y32, R32))
    assert y32.shape == (N, O) and R32.shape == (N, F, F)
    assert jnp.allclose(y32, y_ref, atol=1e-4, rtol=1e-3)
    assert jnp.allclose(R32, R_ref, atol=1e-4, rtol=1e-3)

    # --- ragged batch path: N not divisible by the chosen tile (pad + slice) -
    Nr = 56
    y56, R56 = tensor_fusion_forward(x[:Nr], *params_f32)
    jax.block_until_ready((y56, R56))
    assert y56.shape == (Nr, O) and R56.shape == (Nr, F, F)
    assert jnp.allclose(y56, y_ref[:Nr], atol=1e-4, rtol=1e-3)
    assert jnp.allclose(R56, R_ref[:Nr], atol=1e-4, rtol=1e-3)

    # --- fast path: bf16 MXU operands + bf16 R writeback + pipelined grid ----
    params_bf16 = prepare_tensor_fusion_params(T_tensor, fc_w, fc_b, jnp.bfloat16)
    y16, R16 = tensor_fusion_forward(x, *params_bf16,
                                     r_dtype=jnp.bfloat16, block_n=16)  # grid=(4,)
    jax.block_until_ready((y16, R16))
    assert y16.shape == (N, O) and R16.shape == (N, F, F)
    assert jnp.allclose(R16.astype(jnp.float32), R_ref, atol=5e-2, rtol=5e-2)
    assert jnp.allclose(y16, y_ref, atol=1e-1, rtol=1e-1)

    print("KERNEL_OK")
</pallas_src>

<mosaic_0001>
module attributes {stable_mosaic.version = 11 : i64} {
  func.func @_fusion_kernel(%arg0: i32, %arg1: memref<32x32xf32, #tpu.memory_space<vmem>>, %arg2: memref<32x1024xf32, #tpu.memory_space<vmem>>, %arg3: memref<1024x32xf32, #tpu.memory_space<vmem>>, %arg4: memref<64x16xf32, #tpu.memory_space<vmem>>, %arg5: memref<1x16xf32, #tpu.memory_space<vmem>>, %arg6: memref<32x16xf32, #tpu.memory_space<vmem>>, %arg7: memref<32x1024xf32, #tpu.memory_space<vmem>>) attributes {dimension_semantics = [#tpu.dimension_semantics<parallel>], iteration_bounds = array<i64: 2>, scalar_prefetch = 0 : i64, scratch_operands = 0 : i64, tpu.core_type = #tpu.core_type<tc>, window_params = [{transform_indices = @transform_0, window_bounds = array<i64: 32, 32>}, {pipeline_mode = #tpu.pipeline_mode<synchronous>, transform_indices = @transform_1, window_bounds = array<i64: 32, 1024>}, {pipeline_mode = #tpu.pipeline_mode<synchronous>, transform_indices = @transform_2, window_bounds = array<i64: 1024, 32>}, {pipeline_mode = #tpu.pipeline_mode<synchronous>, transform_indices = @transform_3, window_bounds = array<i64: 64, 16>}, {pipeline_mode = #tpu.pipeline_mode<synchronous>, transform_indices = @transform_4, window_bounds = array<i64: 1, 16>}, {transform_indices = @transform_5, window_bounds = array<i64: 32, 16>}, {transform_indices = @transform_6, window_bounds = array<i64: 32, 1024>}]} {
    %c0 = arith.constant 0 : index
    %c0_0 = arith.constant 0 : index
    %0 = vector.load %arg1[%c0, %c0_0] : memref<32x32xf32, #tpu.memory_space<vmem>>, vector<32x32xf32>
    %c0_1 = arith.constant 0 : index
    %c0_2 = arith.constant 0 : index
    %1 = vector.load %arg2[%c0_1, %c0_2] : memref<32x1024xf32, #tpu.memory_space<vmem>>, vector<32x1024xf32>
    %cst = arith.constant dense<0.000000e+00> : vector<32x1024xf32>
    %2 = tpu.matmul %0, %1, %cst {dimension_numbers = #tpu.dot_dimension_numbers<[1], [0], [0], [1], [0, 0, 1, 1], [], []>} : vector<32x32xf32>, vector<32x1024xf32>, vector<32x1024xf32> -> vector<32x1024xf32>
    %3 = math.tanh %2 : vector<32x1024xf32>
    %c0_3 = arith.constant 0 : index
    %c0_4 = arith.constant 0 : index
    %4 = vector.load %arg7[%c0_3, %c0_4] : memref<32x1024xf32, #tpu.memory_space<vmem>>, vector<32x1024xf32>
    tpu.vector_store %arg7[%c0_3, %c0_4], %3 {strides = array<i32>} : memref<32x1024xf32, #tpu.memory_space<vmem>>, vector<32x1024xf32>,
    %5 = tpu.concatenate %0, %0, %0, %0, %0, %0, %0, %0, %0, %0, %0, %0, %0, %0, %0, %0, %0, %0, %0, %0, %0, %0, %0, %0, %0, %0, %0, %0, %0, %0, %0, %0 in 1 : vector<32x32xf32>, vector<32x32xf32>, vector<32x32xf32>, vector<32x32xf32>, vector<32x32xf32>, vector<32x32xf32>, vector<32x32xf32>, vector<32x32xf32>, vector<32x32xf32>, vector<32x32xf32>, vector<32x32xf32>, vector<32x32xf32>, vector<32x32xf32>, vector<32x32xf32>, vector<32x32xf32>, vector<32x32xf32>, vector<32x32xf32>, vector<32x32xf32>, vector<32x32xf32>, vector<32x32xf32>, vector<32x32xf32>, vector<32x32xf32>, vector<32x32xf32>, vector<32x32xf32>, vector<32x32xf32>, vector<32x32xf32>, vector<32x32xf32>, vector<32x32xf32>, vector<32x32xf32>, vector<32x32xf32>, vector<32x32xf32>, vector<32x32xf32> -> vector<32x1024xf32>
    %6 = arith.mulf %3, %5 : vector<32x1024xf32>
    %c0_5 = arith.constant 0 : index
    %c0_6 = arith.constant 0 : index
    %7 = vector.load %arg3[%c0_5, %c0_6] : memref<1024x32xf32, #tpu.memory_space<vmem>>, vector<1024x32xf32>
    %cst_7 = arith.constant dense<0.000000e+00> : vector<32x32xf32>
    %8 = tpu.matmul %6, %7, %cst_7 {dimension_numbers = #tpu.dot_dimension_numbers<[1], [0], [0], [1], [0, 0, 1, 1], [], []>} : vector<32x1024xf32>, vector<1024x32xf32>, vector<32x32xf32> -> vector<32x32xf32>
    %9 = arith.mulf %0, %8 : vector<32x32xf32>
    %10 = tpu.concatenate %0, %9 in 1 : vector<32x32xf32>, vector<32x32xf32> -> vector<32x64xf32>
    %c0_8 = arith.constant 0 : index
    %c0_9 = arith.constant 0 : index
    %11 = vector.load %arg4[%c0_8, %c0_9] : memref<64x16xf32, #tpu.memory_space<vmem>>, vector<64x16xf32>
    %cst_10 = arith.constant dense<0.000000e+00> : vector<32x16xf32>
    %12 = tpu.matmul %10, %11, %cst_10 {dimension_numbers = #tpu.dot_dimension_numbers<[1], [0], [0], [1], [0, 0, 1, 1], [], []>} : vector<32x64xf32>, vector<64x16xf32>, vector<32x16xf32> -> vector<32x16xf32>
    %c0_11 = arith.constant 0 : index
    %c0_12 = arith.constant 0 : index
    %13 = vector.load %arg5[%c0_11, %c0_12] : memref<1x16xf32, #tpu.memory_space<vmem>>, vector<1x16xf32>
    %14 = vector.broadcast %13 : vector<1x16xf32> to vector<32x16xf32>
    %15 = arith.addf %12, %14 : vector<32x16xf32>
    %cst_13 = arith.constant 5.000000e-01 : f32
    %16 = vector.broadcast %cst_13 : f32 to vector<32x16xf32>
    %17 = arith.mulf %16, %15 : vector<32x16xf32>
    %18 = math.tanh %17 : vector<32x16xf32>
    %19 = math.exp %15 : vector<32x16xf32>
    %cst_14 = arith.constant 1.000000e+00 : f32
    %20 = vector.broadcast %cst_14 : f32 to vector<32x16xf32>
    %21 = arith.addf %19, %20 : vector<32x16xf32>
    %22 = arith.mulf %18, %21 : vector<32x16xf32>
    %cst_15 = arith.constant 0.000000e+00 : f32
    %23 = vector.broadcast %cst_15 : f32 to vector<32x16xf32>
    %24 = arith.cmpf ogt, %15, %23 : vector<32x16xf32>
    %25 = arith.select %24, %15, %22 : vector<32x16xi1>, vector<32x16xf32>
    %c0_16 = arith.constant 0 : index
    %c0_17 = arith.constant 0 : index
    %26 = vector.load %arg6[%c0_16, %c0_17] : memref<32x16xf32, #tpu.memory_space<vmem>>, vector<32x16xf32>
    tpu.vector_store %arg6[%c0_16, %c0_17], %25 {strides = array<i32>} : memref<32x16xf32, #tpu.memory_space<vmem>>, vector<32x16xf32>,
    return
  }
  func.func @transform_0(%arg0: i32) -> (i32, i32) {
    %c0_i32 = arith.constant 0 : i32
    %c0_i32_0 = arith.constant 0 : i32
    return %arg0, %c0_i32 : i32, i32
  }
  func.func @transform_1(%arg0: i32) -> (i32, i32) {
    %c0_i32 = arith.constant 0 : i32
    %c0_i32_0 = arith.constant 0 : i32
    %c0_i32_1 = arith.constant 0 : i32
    return %c0_i32, %c0_i32_0 : i32, i32
  }
  func.func @transform_2(%arg0: i32) -> (i32, i32) {
    %c0_i32 = arith.constant 0 : i32
    %c0_i32_0 = arith.constant 0 : i32
    %c0_i32_1 = arith.constant 0 : i32
    return %c0_i32, %c0_i32_0 : i32, i32
  }
  func.func @transform_3(%arg0: i32) -> (i32, i32) {
    %c0_i32 = arith.constant 0 : i32
    %c0_i32_0 = arith.constant 0 : i32
    %c0_i32_1 = arith.constant 0 : i32
    return %c0_i32, %c0_i32_0 : i32, i32
  }
  func.func @transform_4(%arg0: i32) -> (i32, i32) {
    %c0_i32 = arith.constant 0 : i32
    %c0_i32_0 = arith.constant 0 : i32
    %c0_i32_1 = arith.constant 0 : i32
    return %c0_i32, %c0_i32_0 : i32, i32
  }
  func.func @transform_5(%arg0: i32) -> (i32, i32) {
    %c0_i32 = arith.constant 0 : i32
    %c0_i32_0 = arith.constant 0 : i32
    return %arg0, %c0_i32 : i32, i32
  }
  func.func @transform_6(%arg0: i32) -> (i32, i32) {
    %c0_i32 = arith.constant 0 : i32
    %c0_i32_0 = arith.constant 0 : i32
    return %arg0, %c0_i32 : i32, i32
  }
}

</mosaic_0001>

<bundles_post_ra>
// kernel: tpu_custom_call.1
= control target key start
LH: loop header
LB: loop body
LE: loop exit
PB: predicated region body
PF: predicated region fallthrough
CT: control target
= control target key end

     0   :  { %12 = vsyncpa [#allocation3], 0  ;;  %s3169_s0 = inlined_call_operand.vmem [shape: f32[64,32], index: 0, kind: input, shape index: {}]   ;;  %s3170_s1 = inlined_call_operand.vmem [shape: f32[32,1024], index: 1, kind: input, shape index: {}]   ;;  %s3171_s2 = inlined_call_operand.vmem [shape: f32[1024,32], index: 2, kind: input, shape index: {}]   ;;  %s3172_s3 = inlined_call_operand.vmem [shape: f32[64,16], index: 3, kind: input, shape index: {}]   ;;  %s3173_s4 = inlined_call_operand.vmem [shape: f32[1,16], index: 4, kind: input, shape index: {}]   ;;  %s3174_s5 = inlined_call_operand.vmem [shape: f32[64,16], index: 5, kind: output, shape index: {0}]   ;;  %s3175_s6 = inlined_call_operand.hbm [shape: f32[64,1024], index: 6, kind: output, shape index: {1}]  }
   0x1   :  { %14 = vsyncpa [#allocation3 + $0x1], 0  ;;  %s2235_s21 = smov 0   ;;  %s2237_s22 = smov 0  }
   0x2   :  { %s2239_s23 = smov 0   ;;  %s2241_s24 = smov 0  }
   0x3 LB: > { %s2256_s25 = sadd.s32 4294967295, %s2192_s24   ;;  %s1570_s26 = sadd.s32 4294967294, %s2192_s24   ;;  %s2192_s24 = sphi %s2241_s24, %s3185_s24   ;;  %s2188_s23 = sphi %s2239_s23, %s3184_s23   ;;  %s2184_s22 = sphi %s2237_s22, %s3183_s22   ;;  %s2180_s21 = sphi %s2235_s21, %s3182_s21  }
   0x4   : > { %s2260_s27 = sadd.s32 1, %s2192_s24   ;;  %s163_s28 = sadd.s32 1, %s2188_s23 }
   0x5   : > { %s160_s29 = ssub.s32 %s2192_s24, %s2260_s27  ;;  %p173_p0 = scmp.ne.s32.totalorder %s2188_s23, %s2184_s22 }
   0x6   : > { %p161_p1 = scmp.eq.s32.totalorder %s160_s29, 0  ;;  %p174_p2 = scmp.eq.s32.totalorder %s2256_s25, 1 }
   0x7   : > { %p179_p3 = scmp.ne.s32.totalorder %s2184_s22, %s2180_s21  ;;  %p180_p4 = scmp.eq.s32.totalorder %s1570_s26, 1 }
   0x8   : > { %s2271_s30 = scalar_select %p161_p1, %s2188_s23, %s163_s28  }
   0x9   : > { %p2273_p5 = por %p174_p2, %p173_p0  ;;  %p2277_p6 = por %p180_p4, %p179_p3 }
   0xa   : > { %p1573_p7 = scmp.ge.s32.totalorder %s2192_s24, 1  ;;  %p219_p8 = scmp.lt.s32.totalorder %s2192_s24, 3 }
   0xc   : > { %p220_p9 = pnand %p1573_p7, %p219_p8 }
   0xd   : > { %v272_v0 = vld [vmem:[%s3170_s1 + $0x8] sm:$0xff] (!%p220_p9)  ;;  %v274_v2 = vld [vmem:[%s3170_s1 + $0x18] sm:$0xff] (!%p220_p9)  ;;  %s1575_s15 = sshll.u32 (!%p220_p9), %s2256_s25, 2  ;;  %v271_v5 = vld [vmem:[%s3170_s1] sm:$0xff] (!%p220_p9)  ;;  %v2194_v7 = vmov (!%p220_p9), 0.0   ;;  %vm303_vm0 = vcmask (!%p220_p9), 261120  }
   0xe   : > { %223 = sbr.rel (%p220_p9) target bundleno = 869 (0x365), region = 40  ;;  %v280_v1 = vld [vmem:[%s3170_s1 + $0x48] sm:$0xff] (!%p220_p9)  ;;  %v282_v4 = vld [vmem:[%s3170_s1 + $0x58] sm:$0xff] (!%p220_p9)  ;;  %v279_v6 = vld [vmem:[%s3170_s1 + $0x40] sm:$0xff] (!%p220_p9)  ;;  %380 = vmatprep.mubr.f32.mxu0 (!%p220_p9), %v2194_v7  ;;  %469 = vmatprep.mubr.f32.mxu1 (!%p220_p9), %v2194_v7  ;;  %p255_p10 = scmp.lt.s32.totalorder (!%p220_p9), %s1575_s15, 7  ;;  %vm776_vm1 = vcmask (!%p220_p9), 523264  }
   0xf   : > { %v1818_v3 = vpack.c.bf16 (!%p220_p9), %v280_v1, %v272_v0  ;;  %v1826_v8 = vpack.c.bf16 (!%p220_p9), %v282_v4, %v274_v2  ;;  %v1820_v9 = vpack.c.bf16 (!%p220_p9), %v279_v6, %v271_v5  ;;  %v273_v10 = vld [vmem:[%s3170_s1 + $0x10] sm:$0xff] (!%p220_p9)  ;;  %v288_v12 = vld [vmem:[%s3170_s1 + $0x88] sm:$0xff] (!%p220_p9)  ;;  %v290_v15 = vld [vmem:[%s3170_s1 + $0x98] sm:$0xff] (!%p220_p9)  ;;  %s2195_s28 = smov (!%p220_p9), 32   ;;  %s2196_s20 = smov (!%p220_p9), 96   ;;  %vm781_vm2 = vcmask (!%p220_p9), 785408  }
  0x10   : > { %v281_v11 = vld [vmem:[%s3170_s1 + $0x50] sm:$0xff] (!%p220_p9)  ;;  %v296_v14 = vld [vmem:[%s3170_s1 + $0xc8] sm:$0xff] (!%p220_p9)  ;;  %v298_v16 = vld [vmem:[%s3170_s1 + $0xd8] sm:$0xff] (!%p220_p9)  ;;  %s3177_s12 = smov (!%p220_p9), 64   ;;  %s251_s10 = sand.u32 (!%p220_p9), 1, %s2184_s22  }
  0x11   : > { %1819 = vmatprep.subr.bf16.mxu0 (!%p220_p9), %v1818_v3  ;;  %v1828_v13 = vpack.c.bf16 (!%p220_p9), %v281_v11, %v273_v10  ;;  %1827 = vmatprep.subr.bf16.mxu1 (!%p220_p9), %v1826_v8  ;;  %v1822_v17 = vpack.c.bf16 (!%p220_p9), %v296_v14, %v288_v12  ;;  %v1830_v18 = vpack.c.bf16 (!%p220_p9), %v298_v16, %v290_v15  ;;  %v287_v19 = vld [vmem:[%s3170_s1 + $0x80] sm:$0xff] (!%p220_p9)  ;;  %v289_v21 = vld [vmem:[%s3170_s1 + $0x90] sm:$0xff] (!%p220_p9)  ;;  %v276_v24 = vld [vmem:[%s3170_s1 + $0x28] sm:$0xff] (!%p220_p9)  ;;  %s1574_s11 = sshll.u32 (!%p220_p9), %s251_s10, 8  ;;  %s3115_s29 = scalar_lea.sflag (!%p220_p9), [#allocation3], %s251_s10 }
  0x12   : > { %1821 = vmatpush1.bf16.msra.mxu0 (!%p220_p9), %v1820_v9  ;;  %v295_v20 = vld [vmem:[%s3170_s1 + $0xc0] sm:$0xff] (!%p220_p9)  ;;  %v297_v23 = vld [vmem:[%s3170_s1 + $0xd0] sm:$0xff] (!%p220_p9)  ;;  %v284_v25 = vld [vmem:[%s3170_s1 + $0x68] sm:$0xff] (!%p220_p9)  ;;  %s2719_s17 = scalar_lea.vmem (!%p220_p9), [#allocation2], %s1574_s11 }
  0x13   : > { %1829 = vmatpush1.bf16.msra.mxu1 (!%p220_p9), %v1828_v13  ;;  %v1824_v22 = vpack.c.bf16 (!%p220_p9), %v295_v20, %v287_v19  ;;  %1823 = vmatprep.subr.bf16.mxu0 (!%p220_p9), %v1822_v17  ;;  %v1832_v26 = vpack.c.bf16 (!%p220_p9), %v297_v23, %v289_v21  ;;  %v1834_v27 = vpack.c.bf16 (!%p220_p9), %v284_v25, %v276_v24  ;;  %v278_v28 = vld [vmem:[%s3170_s1 + $0x38] sm:$0xff] (!%p220_p9)  ;;  %v275_v30 = vld [vmem:[%s3170_s1 + $0x20] sm:$0xff] (!%p220_p9)  ;;  %v277_v34 = vld [vmem:[%s3170_s1 + $0x30] sm:$0xff] (!%p220_p9) }
  0x14   : > { %1831 = vmatprep.subr.bf16.mxu1 (!%p220_p9), %v1830_v18  ;;  %v286_v29 = vld [vmem:[%s3170_s1 + $0x78] sm:$0xff] (!%p220_p9)  ;;  %v283_v33 = vld [vmem:[%s3170_s1 + $0x60] sm:$0xff] (!%p220_p9)  ;;  %v285_v35 = vld [vmem:[%s3170_s1 + $0x70] sm:$0xff] (!%p220_p9) }
  0x15   : > { %s3187_s15 = smov (!%p255_p10, %s1575_s15), 7  ;;  %v1842_v32 = vpack.c.bf16 %v286_v29, %v278_v28  ;;  %v1836_v36 = vpack.c.bf16 %v283_v33, %v275_v30  ;;  %v292_v37 = vld [vmem:[%s3170_s1 + $0xa8] sm:$0xff]  ;;  %v1844_v39 = vpack.c.bf16 %v285_v35, %v277_v34  ;;  %v294_v41 = vld [vmem:[%s3170_s1 + $0xb8] sm:$0xff]  ;;  %v291_v43 = vld [vmem:[%s3170_s1 + $0xa0] sm:$0xff] }
  0x16   : > { %s3176_s13 = sshll.u32 %s3187_s15, 3  ;;  %1825 = vmatpush1.bf16.msra.mxu0 %v1824_v22  ;;  %v300_v38 = vld [vmem:[%s3170_s1 + $0xe8] sm:$0xff]  ;;  %v302_v42 = vld [vmem:[%s3170_s1 + $0xf8] sm:$0xff]  ;;  %v299_v45 = vld [vmem:[%s3170_s1 + $0xe0] sm:$0xff] }
  0x17   : > { %s2348_s26 = scalar_lea.vmem %s3169_s0, %s3176_s13  ;;  %1833 = vmatpush1.bf16.msra.mxu1 %v1832_v26  ;;  %1835 = vmatprep.subr.bf16.mxu0 %v1834_v27  ;;  %v1838_v40 = vpack.c.bf16 %v300_v38, %v292_v37  ;;  %v1846_v44 = vpack.c.bf16 %v302_v42, %v294_v41  ;;  %v293_v46 = vld [vmem:[%s3170_s1 + $0xb0] sm:$0xff]  ;;  %v1840_v49 = vpack.c.bf16 %v299_v45, %v291_v43  ;;  %v834_v51 = vld [vmem:[%s3171_s2 + $0x80] sm:$0xff]  ;;  %v835_v52 = vld [vmem:[%s3171_s2 + $0x88] sm:$0xff] }
  0x18   : > { %v2360_v31 = vld [vmem:[%s2348_s26] sm:$0xff]  ;;  %1843 = vmatprep.subr.bf16.mxu1 %v1842_v32  ;;  %v301_v47 = vld [vmem:[%s3170_s1 + $0xf0] sm:$0xff]  ;;  %v2405_v48 = vld [vmem:[%s2348_s26 + $0x8] sm:$0xff]  ;;  %v1850_v56 = vpack.c.bf16 %v835_v52, %v834_v51 }
  0x19   : > { %736 = vrot.lane.b32.xlu0 %v2360_v31, %s2195_s28  ;;  %760 = vrot.lane.b32.xlu1 %v2360_v31, %s2196_s20  ;;  %v1848_v50 = vpack.c.bf16 %v301_v47, %v293_v46  ;;  %v866_v53 = vld [vmem:[%s3171_s2 + $0x180] sm:$0xff]  ;;  %v867_v54 = vld [vmem:[%s3171_s2 + $0x188] sm:$0xff] }
  0x1a   : > { %1579 = vmatmul.mubr.msk.f32.vlgmr.msra.gmra.mrb[0].mxu0 %vm303_vm0, %v2360_v31  ;;  %1583 = vmatmul.mubr.msk.f32.vlgmr.msra.gmra.mrb[0].mxu1 %vm303_vm0, %v2360_v31  ;;  %v2426_v55 = vld [vmem:[%s2348_s26 + $0x10] sm:$0xff]  ;;  %v1882_v57 = vpack.c.bf16 %v867_v54, %v866_v53  ;;  %v2439_v58 = vld [vmem:[%s2348_s26 + $0x18] sm:$0xff]  ;;  %v818_v59 = vld [vmem:[%s3171_s2] sm:$0xff] }
  0x1b   : > { %386 = vmatprep.mubr.f32.mxu0 %v2194_v7  ;;  %475 = vmatprep.mubr.f32.mxu1 %v2194_v7  ;;  %v819_v60 = vld [vmem:[%s3171_s2 + $0x8] sm:$0xff]  ;;  %v850_v61 = vld [vmem:[%s3171_s2 + $0x100] sm:$0xff]  ;;  %v836_v1 = vld [vmem:[%s3171_s2 + $0x90] sm:$0xff] }
  0x1c   : > { %1837 = vmatpush1.bf16.msra.mxu0 %v1836_v36  ;;  %1845 = vmatpush1.bf16.msra.mxu1 %v1844_v39  ;;  %v851_v62 = vld [vmem:[%s3171_s2 + $0x108] sm:$0xff]  ;;  %v1852_v63 = vpack.c.bf16 %v819_v60, %v818_v59  ;;  %v837_v2 = vld [vmem:[%s3171_s2 + $0x98] sm:$0xff]  ;;  %v868_v3 = vld [vmem:[%s3171_s2 + $0x190] sm:$0xff] }
  0x1d   : > { %1839 = vmatprep.subr.bf16.mxu0 %v1838_v40  ;;  %1847 = vmatprep.subr.bf16.mxu1 %v1846_v44  ;;  %v1884_v0 = vpack.c.bf16 %v851_v62, %v850_v61  ;;  %v869_v4 = vld [vmem:[%s3171_s2 + $0x198] sm:$0xff]  ;;  %v1854_v5 = vpack.c.bf16 %v837_v2, %v836_v1  ;;  %v820_v8 = vld [vmem:[%s3171_s2 + $0x10] sm:$0xff]  ;;  %v838_v12 = vld [vmem:[%s3171_s2 + $0xa0] sm:$0xff] }
  0x1e   : > { %1580 = vmatmul.mubr.msk.f32.gmra.mrb[2].mxu0 %vm303_vm0, %v2405_v48  ;;  %1584 = vmatmul.mubr.msk.f32.gmra.mrb[2].mxu1 %vm303_vm0, %v2405_v48  ;;  %v1886_v6 = vpack.c.bf16 %v869_v4, %v868_v3  ;;  %v821_v9 = vld [vmem:[%s3171_s2 + $0x18] sm:$0xff]  ;;  %v852_v10 = vld [vmem:[%s3171_s2 + $0x110] sm:$0xff]  ;;  %v839_v13 = vld [vmem:[%s3171_s2 + $0xa8] sm:$0xff] }
  0x1f   : > { %392 = vmatprep.mubr.f32.mxu0 %v2194_v7  ;;  %481 = vmatprep.mubr.f32.mxu1 %v2194_v7  ;;  %v853_v11 = vld [vmem:[%s3171_s2 + $0x118] sm:$0xff]  ;;  %v870_v14 = vld [vmem:[%s3171_s2 + $0x1a0] sm:$0xff]  ;;  %v871_v15 = vld [vmem:[%s3171_s2 + $0x1a8] sm:$0xff]  ;;  %v1856_v16 = vpack.c.bf16 %v821_v9, %v820_v8  ;;  %v1858_v18 = vpack.c.bf16 %v839_v13, %v838_v12 }
  0x20   : > { %1841 = vmatpush1.bf16.msra.mxu0 %v1840_v49  ;;  %1849 = vmatpush1.bf16.msra.mxu1 %v1848_v50  ;;  %v1888_v17 = vpack.c.bf16 %v853_v11, %v852_v10  ;;  %v822_v19 = vld [vmem:[%s3171_s2 + $0x20] sm:$0xff]  ;;  %v823_v20 = vld [vmem:[%s3171_s2 + $0x28] sm:$0xff]  ;;  %v1890_v22 = vpack.c.bf16 %v871_v15, %v870_v14  ;;  %v840_v24 = vld [vmem:[%s3171_s2 + $0xb0] sm:$0xff] }
  0x21   : > { %748 = vrot.lane.b32.xlu0 %v2360_v31, %s3177_s12  ;;  %738 = vrot.lane.b32.xlu1 %v2405_v48, %s2195_s28  ;;  %v854_v21 = vld [vmem:[%s3171_s2 + $0x120] sm:$0xff]  ;;  %v855_v23 = vld [vmem:[%s3171_s2 + $0x128] sm:$0xff]  ;;  %v1860_v28 = vpack.c.bf16 %v823_v20, %v822_v19 }
  0x22   : > { %1581 = vmatmul.mubr.msk.f32.gmra.mrb[4].mxu0 %vm303_vm0, %v2426_v55  ;;  %1585 = vmatmul.mubr.msk.f32.gmra.mrb[4].mxu1 %vm303_vm0, %v2426_v55  ;;  %v841_v25 = vld [vmem:[%s3171_s2 + $0xb8] sm:$0xff]  ;;  %v872_v26 = vld [vmem:[%s3171_s2 + $0x1b0] sm:$0xff]  ;;  %v1892_v29 = vpack.c.bf16 %v855_v23, %v854_v21  ;;  %v842_v36 = vld [vmem:[%s3171_s2 + $0xc0] sm:$0xff] }
  0x23   : > { %398 = vmatprep.mubr.f32.mxu0 %v2194_v7  ;;  %487 = vmatprep.mubr.f32.mxu1 %v2194_v7  ;;  %v873_v27 = vld [vmem:[%s3171_s2 + $0x1b8] sm:$0xff]  ;;  %v1862_v30 = vpack.c.bf16 %v841_v25, %v840_v24  ;;  %v824_v32 = vld [vmem:[%s3171_s2 + $0x30] sm:$0xff]  ;;  %v843_v37 = vld [vmem:[%s3171_s2 + $0xc8] sm:$0xff] }
  0x24   : > { %1851 = vmatprep.subr.bf16.mxu0 %v1850_v56  ;;  %1883 = vmatprep.subr.bf16.mxu1 %v1882_v57  ;;  %v825_v33 = vld [vmem:[%s3171_s2 + $0x38] sm:$0xff]  ;;  %v856_v34 = vld [vmem:[%s3171_s2 + $0x130] sm:$0xff]  ;;  %v874_v38 = vld [vmem:[%s3171_s2 + $0x1c0] sm:$0xff]  ;;  %v1866_v42 = vpack.c.bf16 %v843_v37, %v842_v36 }
  0x25   : > { %750 = vrot.lane.b32.xlu0 %v2405_v48, %s3177_s12  ;;  %762 = vrot.lane.b32.xlu1 %v2405_v48, %s2196_s20  ;;  %v857_v35 = vld [vmem:[%s3171_s2 + $0x138] sm:$0xff]  ;;  %v875_v39 = vld [vmem:[%s3171_s2 + $0x1c8] sm:$0xff]  ;;  %v1864_v40 = vpack.c.bf16 %v825_v33, %v824_v32 }
  0x26   : > { %1582 = vmatmul.mubr.msk.f32.gmra.mrb[6].mxu0 %vm303_vm0, %v2439_v58  ;;  %1586 = vmatmul.mubr.msk.f32.gmra.mrb[6].mxu1 %vm303_vm0, %v2439_v58  ;;  %v1896_v41 = vpack.c.bf16 %v857_v35, %v856_v34  ;;  %v1898_v43 = vpack.c.bf16 %v875_v39, %v874_v38  ;;  %v826_v44 = vld [vmem:[%s3171_s2 + $0x40] sm:$0xff]  ;;  %v827_v45 = vld [vmem:[%s3171_s2 + $0x48] sm:$0xff]  ;;  %v844_v51 = vld [vmem:[%s3171_s2 + $0xd0] sm:$0xff] }
  0x27   : > { %558 = vmatprep.mubr.f32.mxu0 %v2194_v7  ;;  %647 = vmatprep.mubr.f32.mxu1 %v2194_v7  ;;  %v858_v46 = vld [vmem:[%s3171_s2 + $0x140] sm:$0xff]  ;;  %v1868_v47 = vpack.c.bf16 %v827_v45, %v826_v44  ;;  %v859_v49 = vld [vmem:[%s3171_s2 + $0x148] sm:$0xff]  ;;  %v845_v52 = vld [vmem:[%s3171_s2 + $0xd8] sm:$0xff] }
  0x28   : > { %v1900_v50 = vpack.c.bf16 %v859_v49, %v858_v46  ;;  %v876_v53 = vld [vmem:[%s3171_s2 + $0x1d0] sm:$0xff]  ;;  %v1870_v54 = vpack.c.bf16 %v845_v52, %v844_v51  ;;  %v877_v56 = vld [vmem:[%s3171_s2 + $0x1d8] sm:$0xff]  ;;  %v846_v1 = vld [vmem:[%s3171_s2 + $0xe0] sm:$0xff] }
  0x29   : > { %740 = vrot.lane.b32.xlu0 %v2426_v55, %s2195_s28  ;;  %752 = vrot.lane.b32.xlu1 %v2426_v55, %s3177_s12  ;;  %v828_v57 = vld [vmem:[%s3171_s2 + $0x50] sm:$0xff]  ;;  %v829_v59 = vld [vmem:[%s3171_s2 + $0x58] sm:$0xff]  ;;  %v1902_v60 = vpack.c.bf16 %v877_v56, %v876_v53 }
  0x2a   : > { %1587 = vmatmul.mubr.msk.f32.vlgmr.msra.gmra.mrb[8].mxu0 %vm303_vm0, %v2360_v31  ;;  %1591 = vmatmul.mubr.msk.f32.vlgmr.msra.gmra.mrb[8].mxu1 %vm303_vm0, %v2360_v31  ;;  %v1872_v61 = vpack.c.bf16 %v829_v59, %v828_v57  ;;  %v860_v62 = vld [vmem:[%s3171_s2 + $0x150] sm:$0xff]  ;;  %v847_v2 = vld [vmem:[%s3171_s2 + $0xe8] sm:$0xff]  ;;  %v878_v3 = vld [vmem:[%s3171_s2 + $0x1e0] sm:$0xff] }
  0x2b   : > { %564 = vmatprep.mubr.f32.mxu0 %v2194_v7  ;;  %653 = vmatprep.mubr.f32.mxu1 %v2194_v7  ;;  %v1874_v4 = vpack.c.bf16 %v847_v2, %v846_v1  ;;  %v831_v8 = vld [vmem:[%s3171_s2 + $0x68] sm:$0xff]  ;;  %v862_v11 = vld [vmem:[%s3171_s2 + $0x160] sm:$0xff]  ;;  %v848_v14 = vld [vmem:[%s3171_s2 + $0xf0] sm:$0xff] }
  0x2c   : > { %1853 = vmatpush3.bf16.msra.mxu0 %v1852_v63  ;;  %1885 = vmatpush3.bf16.msra.mxu1 %v1884_v0  ;;  %v861_v63 = vld [vmem:[%s3171_s2 + $0x158] sm:$0xff]  ;;  %v863_v12 = vld [vmem:[%s3171_s2 + $0x168] sm:$0xff]  ;;  %v832_v19 = vld [vmem:[%s3171_s2 + $0x70] sm:$0xff] }
  0x2d   : > { %764 = vrot.lane.b32.xlu0 %v2426_v55, %s2196_s20  ;;  %742 = vrot.lane.b32.xlu1 %v2439_v58, %s2195_s28  ;;  %v1904_v0 = vpack.c.bf16 %v861_v63, %v860_v62  ;;  %v1908_v13 = vpack.c.bf16 %v863_v12, %v862_v11  ;;  %v849_v15 = vld [vmem:[%s3171_s2 + $0xf8] sm:$0xff]  ;;  %v864_v23 = vld [vmem:[%s3171_s2 + $0x170] sm:$0xff] }
  0x2e   : > { %1588 = vmatmul.mubr.msk.f32.gmra.mrb[10].mxu0 %vm303_vm0, %v2405_v48  ;;  %1592 = vmatmul.mubr.msk.f32.gmra.mrb[10].mxu1 %vm303_vm0, %v2405_v48  ;;  %v833_v20 = vld [vmem:[%s3171_s2 + $0x78] sm:$0xff]  ;;  %v2694_v57 = vld [vmem:[%s3171_s2 + $0x208] sm:$0xff]  ;;  %v2712_v63 = vld [vmem:[%s3171_s2 + $0x290] sm:$0xff] }
  0x2f   : > { %570 = vmatprep.mubr.f32.mxu0 %v2194_v7  ;;  %659 = vmatprep.mubr.f32.mxu1 %v2194_v7  ;;  %v865_v24 = vld [vmem:[%s3171_s2 + $0x178] sm:$0xff]  ;;  %v2704_v59 = vld [vmem:[%s3171_s2 + $0x308] sm:$0xff] }
  0x30   : > { %1855 = vmatprep.subr.bf16.mxu0 %v1854_v5  ;;  %1887 = vmatprep.subr.bf16.mxu1 %v1886_v6  ;;  %v879_v5 = vld [vmem:[%s3171_s2 + $0x1e8] sm:$0xff]  ;;  %v830_v6 = vld [vmem:[%s3171_s2 + $0x60] sm:$0xff]  ;;  %v1912_v25 = vpack.c.bf16 %v865_v24, %v864_v23  ;;  %v2740_v12 = vld [vmem:[%s3171_s2 + $0x398] sm:$0xff] }
  0x31   : > { %754 = vrot.lane.b32.xlu0 %v2439_v58, %s3177_s12  ;;  %766 = vrot.lane.b32.xlu1 %v2439_v58, %s2196_s20  ;;  %v1906_v9 = vpack.c.bf16 %v879_v5, %v878_v3  ;;  %v1876_v10 = vpack.c.bf16 %v831_v8, %v830_v6 }
  0x32   : > { %1589 = vmatmul.mubr.msk.f32.gmra.mrb[12].mxu0 %vm303_vm0, %v2426_v55  ;;  %1593 = vmatmul.mubr.msk.f32.gmra.mrb[12].mxu1 %vm303_vm0, %v2426_v55 }
  0x33   : > { %576 = vmatprep.mubr.f32.mxu0 %v2194_v7  ;;  %665 = vmatprep.mubr.f32.mxu1 %v2194_v7  ;;  %v1894_v7 = vpack.c.bf16 %v873_v27, %v872_v26  ;;  %v898_v26 = vld [vmem:[%s3171_s2 + $0x280] sm:$0xff]  ;;  %v899_v27 = vld [vmem:[%s3171_s2 + $0x288] sm:$0xff] }
  0x34   : > { %1857 = vmatpush3.bf16.msra.mxu0 %v1856_v16  ;;  %1889 = vmatpush3.bf16.msra.mxu1 %v1888_v17  ;;  %v880_v16 = vld [vmem:[%s3171_s2 + $0x1f0] sm:$0xff]  ;;  %v1878_v17 = vpack.c.bf16 %v849_v15, %v848_v14 }
  0x35   : > { %1859 = vmatprep.subr.bf16.mxu0 %v1858_v18  ;;  %1891 = vmatprep.subr.bf16.mxu1 %v1890_v22  ;;  %v881_v18 = vld [vmem:[%s3171_s2 + $0x1f8] sm:$0xff]  ;;  %v1880_v22 = vpack.c.bf16 %v833_v20, %v832_v19  ;;  %v2762_v20 = vld [vmem:[%s3171_s2 + $0x310] sm:$0xff] }
  0x36   : > { %1590 = vmatmul.mubr.msk.f32.gmra.mrb[14].mxu0 %vm303_vm0, %v2439_v58  ;;  %1594 = vmatmul.mubr.msk.f32.gmra.mrb[14].mxu1 %vm303_vm0, %v2439_v58  ;;  %v1910_v21 = vpack.c.bf16 %v881_v18, %v880_v16  ;;  %v2757_v19 = vld [vmem:[%s3171_s2 + $0x218] sm:$0xff] }
  0x38   : > { %1861 = vmatpush3.bf16.msra.mxu0 %v1860_v28  ;;  %1893 = vmatpush3.bf16.msra.mxu1 %v1892_v29  ;;  %v930_v28 = vld [vmem:[%s3171_s2 + $0x380] sm:$0xff]  ;;  %v1914_v29 = vpack.c.bf16 %v899_v27, %v898_v26 }
  0x39   : > { %1863 = vmatprep.subr.bf16.mxu0 %v1862_v30  ;;  %1895 = vmatprep.subr.bf16.mxu1 %v1894_v7  ;;  %v931_v30 = vld [vmem:[%s3171_s2 + $0x388] sm:$0xff] }
  0x3a   : > { %v1946_v32 = vpack.c.bf16 %v931_v30, %v930_v28 }
  0x3c   : > { %1865 = vmatpush3.bf16.msra.mxu0 %v1864_v40  ;;  %1897 = vmatpush3.bf16.msra.mxu1 %v1896_v41 }
  0x3d   : > { %1867 = vmatprep.subr.bf16.mxu0 %v1866_v42  ;;  %1899 = vmatprep.subr.bf16.mxu1 %v1898_v43 }
  0x40   : > { %1869 = vmatpush3.bf16.msra.mxu0 %v1868_v47  ;;  %1901 = vmatpush3.bf16.msra.mxu1 %v1900_v50 }
  0x41   : > { %1871 = vmatprep.subr.bf16.mxu0 %v1870_v54  ;;  %1903 = vmatprep.subr.bf16.mxu1 %v1902_v60  ;;  %v2688_v54 = vld [vmem:[%s3171_s2 + $0x200] sm:$0xff] }
  0x44   : > { %1873 = vmatpush3.bf16.msra.mxu0 %v1872_v61  ;;  %1905 = vmatpush3.bf16.msra.mxu1 %v1904_v0  ;;  %v2717_v0 = vld [vmem:[%s3171_s2 + $0x298] sm:$0xff] }
  0x45   : > { %1875 = vmatprep.subr.bf16.mxu0 %v1874_v4  ;;  %1907 = vmatprep.subr.bf16.mxu1 %v1906_v9  ;;  %v1918_v18 = vpack.c.bf16 %v2717_v0, %v2712_v63 }
  0x48   : > { %1877 = vmatpush3.bf16.msra.mxu0 %v1876_v10  ;;  %1909 = vmatpush3.bf16.msra.mxu1 %v1908_v13  ;;  %v1916_v10 = vpack.c.bf16 %v2694_v57, %v2688_v54  ;;  %v2745_v13 = vld [vmem:[%s3171_s2 + $0x210] sm:$0xff] }
  0x49   : > { %1879 = vmatprep.subr.bf16.mxu0 %v1878_v17  ;;  %1911 = vmatprep.subr.bf16.mxu1 %v1910_v21  ;;  %v2767_v21 = vld [vmem:[%s3171_s2 + $0x318] sm:$0xff] }
  0x4c   : > { %1881 = vmatpush3.bf16.msra.mxu0 %v1880_v22  ;;  %1913 = vmatpush3.bf16.msra.mxu1 %v1912_v25 }
  0x4d   : > { %1915 = vmatprep.subr.bf16.mxu0 %v1914_v29  ;;  %1947 = vmatprep.subr.bf16.mxu1 %v1946_v32  ;;  %v2782_v32 = vld [vmem:[%s3171_s2 + $0x2a0] sm:$0xff] }
  0x8b   : > { %v737_v33 = vpop.permute.xlu0 %736  ;;  %v761_v34 = vpop.permute.xlu1 %760 }
  0x8c   : > { %v772_v49 = vsel %vm303_vm0, %v2360_v31, %v737_v33  ;;  %v2787_v33 = vld [vmem:[%s3171_s2 + $0x2a8] sm:$0xff] }
  0x93   : > { %v749_v7 = vpop.permute.xlu0 %748  ;;  %v739_v35 = vpop.permute.xlu1 %738 }
  0x94   : > { %v773_v50 = vsel %vm303_vm0, %v2405_v48, %v739_v35  ;;  %v777_v56 = vsel %vm776_vm1, %v772_v49, %v749_v7  ;;  %v2699_v48 = vld [vmem:[%s3171_s2 + $0x300] sm:$0xff] }
  0x95   : > { %v2726_v6 = vsel %vm781_vm2, %v777_v56, %v761_v34  ;;  %v1948_v11 = vpack.c.bf16 %v2704_v59, %v2699_v48  ;;  %v2838_v48 = vld [vmem:[%s3171_s2 + $0x328] sm:$0xff]  ;;  %v2843_v59 = vld [vmem:[%s3171_s2 + $0x2b0] sm:$0xff] }
  0x97   : > { %v751_v36 = vpop.permute.xlu0 %750  ;;  %v763_v38 = vpop.permute.xlu1 %762 }
  0x98   : > { %v778_v62 = vsel %vm776_vm1, %v773_v50, %v751_v36 }
  0x99   : > { %v2749_v15 = vsel %vm781_vm2, %v778_v62, %v763_v38 }
  0x9b   : > { %v741_v43 = vpop.permute.xlu0 %740  ;;  %v753_v47 = vpop.permute.xlu1 %752 }
  0x9c   : > { %v774_v3 = vsel %vm303_vm0, %v2426_v55, %v741_v43  ;;  %v2735_v55 = vld [vmem:[%s3171_s2 + $0x390] sm:$0xff] }
  0x9d   : > { %v779_v25 = vsel %vm776_vm1, %v774_v3, %v753_v47  ;;  %v1950_v29 = vpack.c.bf16 %v2740_v12, %v2735_v55  ;;  %v2820_v47 = vld [vmem:[%s3171_s2 + $0x228] sm:$0xff]  ;;  %v2862_v3 = vld [vmem:[%s3171_s2 + $0x3b8] sm:$0xff] }
  0x9f   : > { %v2706_v60 = vpop.permute.xlu0 %764  ;;  %v743_v4 = vpop.permute.xlu1 %742 }
  0xa0   : > { %v775_v30 = vsel %vm303_vm0, %v2439_v58, %v743_v4  ;;  %v1920_v58 = vpack.c.bf16 %v2757_v19, %v2745_v13  ;;  %v2808_v43 = vsel %vm781_vm2, %v779_v25, %v2706_v60  ;;  %v2848_v60 = vld [vmem:[%s3171_s2 + $0x2b8] sm:$0xff] }
  0xa1   : > { %v1926_v13 = vpack.c.bf16 %v2848_v60, %v2843_v59 }
  0xa3   : > { %v755_v34 = vpop.permute.xlu0 %754  ;;  %v767_v54 = vpop.permute.xlu1 %766 }
  0xed   : > { %v382_v37 = vpop.f32.mrb[0].mxu0  ;;  %v471_v39 = vpop.f32.mrb[0].mxu1 }
  0xee   : > { %2046 = vtanh.f32 %v382_v37  ;;  %v384_v40 = vpop.f32.mrb[1].mxu0  ;;  %v473_v41 = vpop.f32.mrb[1].mxu1  ;;  %v1952_v37 = vpack.c.bf16 %v2767_v21, %v2762_v20  ;;  %v921_v21 = vld [vmem:[%s3171_s2 + $0x338] sm:$0xff] }
  0xef   : > { %2048 = vtanh.f32 %v471_v39  ;;  %v2798_v39 = vld [vmem:[%s3171_s2 + $0x3a0] sm:$0xff] }
  0xf0   : > { %2050 = vtanh.f32 %v384_v40  ;;  %v2803_v40 = vld [vmem:[%s3171_s2 + $0x3a8] sm:$0xff] }
  0xf1   : > { %2052 = vtanh.f32 %v473_v41  ;;  %v388_v42 = vpop.f32.mrb[2].mxu0  ;;  %v477_v44 = vpop.f32.mrb[2].mxu1  ;;  %v1954_v57 = vpack.c.bf16 %v2803_v40, %v2798_v39  ;;  %v891_v39 = vld [vmem:[%s3171_s2 + $0x248] sm:$0xff]  ;;  %v922_v40 = vld [vmem:[%s3171_s2 + $0x340] sm:$0xff] }
  0xf2   : > { %2054 = vtanh.f32 %v388_v42  ;;  %v390_v45 = vpop.f32.mrb[3].mxu0  ;;  %v479_v46 = vpop.f32.mrb[3].mxu1 }
  0xf3   : > { %2056 = vtanh.f32 %v477_v44 }
  0xf4   : > { %2058 = vtanh.f32 %v390_v45 }
  0xf5   : > { %2060 = vtanh.f32 %v479_v46  ;;  %v394_v51 = vpop.f32.mrb[4].mxu0  ;;  %v483_v52 = vpop.f32.mrb[4].mxu1  ;;  %v2815_v46 = vld [vmem:[%s3171_s2 + $0x220] sm:$0xff] }
  0xf6   : > { %2062 = vtanh.f32 %v394_v51  ;;  %v396_v53 = vpop.f32.mrb[5].mxu0  ;;  %v485_v31 = vpop.f32.mrb[5].mxu1  ;;  %v1922_v51 = vpack.c.bf16 %v2787_v33, %v2782_v32  ;;  %v1924_v0 = vpack.c.bf16 %v2820_v47, %v2815_v46  ;;  %v908_v46 = vld [vmem:[%s3171_s2 + $0x2d0] sm:$0xff]  ;;  %v909_v47 = vld [vmem:[%s3171_s2 + $0x2d8] sm:$0xff] }
  0xf7   : > { %2064 = vtanh.f32 %v483_v52  ;;  %v780_v52 = vsel %vm776_vm1, %v775_v30, %v755_v34 }
  0xf8   : > { %v2047_v61 = vpop.eup %2046  ;;  %2066 = vtanh.f32 %v396_v53  ;;  %v2830_v53 = vld [vmem:[%s3171_s2 + $0x320] sm:$0xff] }
  0xf9   : > { %v2049_v1 = vpop.eup %2048  ;;  %704 = vst [vmem:[%s2719_s17] sm:$0xff] %v2047_v61  ;;  %2068 = vtanh.f32 %v485_v31  ;;  %v400_v2 = vpop.f32.mrb[6].mxu0  ;;  %v786_v24 = vmul.f32 %v2047_v61, %v2726_v6  ;;  %v1956_v55 = vpack.c.bf16 %v2838_v48, %v2830_v53  ;;  %v941_v53 = vld [vmem:[%s3171_s2 + $0x3d8] sm:$0xff] }
  0xfa   : > { %v2051_v5 = vpop.eup %2050  ;;  %706 = vst [vmem:[%s2719_s17 + $0x10] sm:$0xff] %v2049_v1  ;;  %2070 = vtanh.f32 %v400_v2  ;;  %v489_v8 = vpop.f32.mrb[6].mxu1  ;;  %v788_v28 = vmul.f32 %v2049_v1, %v2726_v6  ;;  %v2857_v2 = vld [vmem:[%s3171_s2 + $0x3b0] sm:$0xff] }
  0xfb   : > { %v402_v9 = vpop.f32.mrb[7].mxu0  ;;  %v2053_v14 = vpop.eup %2052  ;;  %705 = vst [vmem:[%s2719_s17 + $0x8] sm:$0xff] %v2051_v5  ;;  %2072 = vtanh.f32 %v489_v8  ;;  %v787_v17 = vmul.f32 %v2051_v5, %v2726_v6  ;;  %v2866_v8 = vsel %vm781_vm2, %v780_v52, %v767_v54  ;;  %v1958_v20 = vpack.c.bf16 %v2862_v3, %v2857_v2  ;;  %v940_v52 = vld [vmem:[%s3171_s2 + $0x3d0] sm:$0xff]  ;;  %v925_v3 = vld [vmem:[%s3171_s2 + $0x358] sm:$0xff] }
  0xfc   : > { %v491_v16 = vpop.f32.mrb[7].mxu1  ;;  %v2055_v22 = vpop.eup %2054  ;;  %707 = vst [vmem:[%s2719_s17 + $0x18] sm:$0xff] %v2053_v14  ;;  %2074 = vtanh.f32 %v402_v9  ;;  %v789_v23 = vmul.f32 %v2053_v14, %v2726_v6  ;;  %v2879_v14 = vld [vmem:[%s3171_s2 + $0x230] sm:$0xff]  ;;  %v1966_v2 = vpack.c.bf16 %v941_v53, %v940_v52 }
  0xfd   : > { %v2057_v26 = vpop.eup %2056  ;;  %712 = vst [vmem:[%s2719_s17 + $0x40] sm:$0xff] %v2055_v22  ;;  %2076 = vtanh.f32 %v491_v16  ;;  %1010 = vmatprep.mubr.f32.mxu0 %v787_v17  ;;  %v560_v27 = vpop.f32.mrb[8].mxu0  ;;  %v794_v38 = vmul.f32 %v2055_v22, %v2749_v15  ;;  %v2884_v16 = vld [vmem:[%s3171_s2 + $0x238] sm:$0xff]  ;;  %v2889_v17 = vld [vmem:[%s3171_s2 + $0x330] sm:$0xff]  ;;  %v2900_v22 = vld [vmem:[%s3171_s2 + $0x2c0] sm:$0xff] }
  0xfe   : > { %v2059_v7 = vpop.eup %2058  ;;  %714 = vst [vmem:[%s2719_s17 + $0x50] sm:$0xff] %v2057_v26  ;;  %1095 = vmatprep.mubr.f32.mxu1 %v789_v23  ;;  %2078 = vtanh.f32 %v560_v27  ;;  %v649_v35 = vpop.f32.mrb[8].mxu1  ;;  %1011 = vmatmul.mubr.f32.vlgmr.msra.gmra.mrb[16].mxu0 %v786_v24  ;;  %v796_v45 = vmul.f32 %v2057_v26, %v2749_v15  ;;  %v907_v23 = vld [vmem:[%s3171_s2 + $0x2c8] sm:$0xff]  ;;  %v1928_v33 = vpack.c.bf16 %v2884_v16, %v2879_v14 }
  0xff   : > { %v562_v36 = vpop.f32.mrb[9].mxu0  ;;  %v2061_v41 = vpop.eup %2060  ;;  %713 = vst [vmem:[%s2719_s17 + $0x48] sm:$0xff] %v2059_v7  ;;  %2080 = vtanh.f32 %v649_v35  ;;  %1096 = vmatmul.mubr.f32.vlgmr.msra.gmra.mrb[16].mxu1 %v788_v28  ;;  %1917 = vmatpush3.bf16.msra.mxu0 %v1916_v10  ;;  %v795_v44 = vmul.f32 %v2059_v7, %v2749_v15  ;;  %v2910_v28 = vld [vmem:[%s3171_s2 + $0x3c0] sm:$0xff] }
 0x100   : > { %v651_v42 = vpop.f32.mrb[9].mxu1  ;;  %v2063_v49 = vpop.eup %2062  ;;  %715 = vst [vmem:[%s2719_s17 + $0x58] sm:$0xff] %v2061_v41  ;;  %1949 = vmatpush3.bf16.msra.mxu1 %v1948_v11  ;;  %2082 = vtanh.f32 %v562_v36  ;;  %1919 = vmatprep.subr.bf16.mxu0 %v1918_v18  ;;  %v797_v50 = vmul.f32 %v2061_v41, %v2749_v15  ;;  %v1960_v36 = vpack.c.bf16 %v921_v21, %v2889_v17  ;;  %v894_v17 = vld [vmem:[%s3171_s2 + $0x260] sm:$0xff] }
 0x101   : > { %v2065_v56 = vpop.eup %2064  ;;  %720 = vst [vmem:[%s2719_s17 + $0x80] sm:$0xff] %v2063_v49  ;;  %2084 = vtanh.f32 %v651_v42  ;;  %1951 = vmatprep.subr.bf16.mxu1 %v1950_v29  ;;  %v566_v31 = vpop.f32.mrb[10].mxu0  ;;  %1015 = vmatprep.mubr.f32.mxu0 %v795_v44  ;;  %v802_v1 = vmul.f32 %v2063_v49, %v2808_v43  ;;  %v2915_v29 = vld [vmem:[%s3171_s2 + $0x3c8] sm:$0xff] }
 0x102   : > { %v2067_v61 = vpop.eup %2066  ;;  %722 = vst [vmem:[%s2719_s17 + $0x90] sm:$0xff] %v2065_v56  ;;  %2086 = vtanh.f32 %v566_v31  ;;  %v655_v62 = vpop.f32.mrb[10].mxu1  ;;  %1100 = vmatprep.mubr.f32.mxu1 %v797_v50  ;;  %1016 = vmatmul.mubr.f32.gmra.mrb[18].mxu0 %v794_v38  ;;  %v804_v10 = vmul.f32 %v2065_v56, %v2808_v43  ;;  %v890_v38 = vld [vmem:[%s3171_s2 + $0x240] sm:$0xff]  ;;  %v1962_v44 = vpack.c.bf16 %v2915_v29, %v2910_v28 }
 0x103   : > { %v568_v63 = vpop.f32.mrb[11].mxu0  ;;  %v2069_v4 = vpop.eup %2068  ;;  %721 = vst [vmem:[%s2719_s17 + $0x88] sm:$0xff] %v2067_v61  ;;  %2088 = vtanh.f32 %v655_v62  ;;  %1921 = vmatpush3.bf16.msra.mxu0 %v1920_v58  ;;  %1101 = vmatmul.mubr.f32.gmra.mrb[18].mxu1 %v796_v45  ;;  %v803_v9 = vmul.f32 %v2067_v61, %v2808_v43  ;;  %v923_v45 = vld [vmem:[%s3171_s2 + $0x348] sm:$0xff]  ;;  %v1934_v61 = vpack.c.bf16 %v909_v47, %v908_v46  ;;  %v892_v62 = vld [vmem:[%s3171_s2 + $0x250] sm:$0xff] }
 0x104   : > { %v657_v5 = vpop.f32.mrb[11].mxu1  ;;  %v2071_v11 = vpop.eup %2070  ;;  %723 = vst [vmem:[%s2719_s17 + $0x98] sm:$0xff] %v2069_v4  ;;  %1953 = vmatpush3.bf16.msra.mxu1 %v1952_v37  ;;  %2090 = vtanh.f32 %v568_v63  ;;  %1923 = vmatprep.subr.bf16.mxu0 %v1922_v51  ;;  %v805_v12 = vmul.f32 %v2069_v4, %v2808_v43  ;;  %v1930_v37 = vpack.c.bf16 %v907_v23, %v2900_v22  ;;  %v893_v63 = vld [vmem:[%s3171_s2 + $0x258] sm:$0xff]  ;;  %v910_v4 = vld [vmem:[%s3171_s2 + $0x2e0] sm:$0xff]  ;;  %v927_v22 = vld [vmem:[%s3171_s2 + $0x368] sm:$0xff] }
 0x105   : > { %v2073_v18 = vpop.eup %2072  ;;  %728 = vst [vmem:[%s2719_s17 + $0xc0] sm:$0xff] %v2071_v11  ;;  %2092 = vtanh.f32 %v657_v5  ;;  %1955 = vmatprep.subr.bf16.mxu1 %v1954_v57  ;;  %v572_v19 = vpop.f32.mrb[12].mxu0  ;;  %1020 = vmatprep.mubr.f32.mxu0 %v803_v9  ;;  %v810_v27 = vmul.f32 %v2071_v11, %v2866_v8  ;;  %v1932_v57 = vpack.c.bf16 %v891_v39, %v890_v38  ;;  %v911_v5 = vld [vmem:[%s3171_s2 + $0x2e8] sm:$0xff]  ;;  %v912_v23 = vld [vmem:[%s3171_s2 + $0x2f0] sm:$0xff]  ;;  %v929_v38 = vld [vmem:[%s3171_s2 + $0x378] sm:$0xff] }
 0x106   : > { %v2075_v24 = vpop.eup %2074  ;;  %730 = vst [vmem:[%s2719_s17 + $0xd0] sm:$0xff] %v2073_v18  ;;  %2094 = vtanh.f32 %v572_v19  ;;  %v661_v25 = vpop.f32.mrb[12].mxu1  ;;  %1105 = vmatprep.mubr.f32.mxu1 %v805_v12  ;;  %1021 = vmatmul.mubr.f32.gmra.mrb[20].mxu0 %v802_v1  ;;  %v812_v7 = vmul.f32 %v2073_v18, %v2866_v8  ;;  %v1964_v60 = vpack.c.bf16 %v923_v45, %v922_v40  ;;  %v943_v11 = vld [vmem:[%s3171_s2 + $0x3e8] sm:$0xff]  ;;  %v926_v19 = vld [vmem:[%s3171_s2 + $0x360] sm:$0xff] }
 0x107   : > { %v574_v26 = vpop.f32.mrb[13].mxu0  ;;  %v2077_v30 = vpop.eup %2076  ;;  %729 = vst [vmem:[%s2719_s17 + $0xc8] sm:$0xff] %v2075_v24  ;;  %2096 = vtanh.f32 %v661_v25  ;;  %1925 = vmatpush3.bf16.msra.mxu0 %v1924_v0  ;;  %1106 = vmatmul.mubr.f32.gmra.mrb[20].mxu1 %v804_v10  ;;  %v811_v34 = vmul.f32 %v2075_v24, %v2866_v8  ;;  %v924_v0 = vld [vmem:[%s3171_s2 + $0x350] sm:$0xff]  ;;  %v942_v10 = vld [vmem:[%s3171_s2 + $0x3e0] sm:$0xff]  ;;  %v1936_v12 = vpack.c.bf16 %v893_v63, %v892_v62  ;;  %v895_v18 = vld [vmem:[%s3171_s2 + $0x268] sm:$0xff] }
 0x108   : > { %v663_v32 = vpop.f32.mrb[13].mxu1  ;;  %v2922_v35 = vpop.eup %2078  ;;  %731 = vst [vmem:[%s2719_s17 + $0xd8] sm:$0xff] %v2077_v30  ;;  %1957 = vmatpush3.bf16.msra.mxu1 %v1956_v55  ;;  %2098 = vtanh.f32 %v574_v26  ;;  %1927 = vmatprep.subr.bf16.mxu0 %v1926_v13  ;;  %v813_v58 = vmul.f32 %v2077_v30, %v2866_v8  ;;  %v1968_v14 = vpack.c.bf16 %v925_v3, %v924_v0  ;;  %v913_v24 = vld [vmem:[%s3171_s2 + $0x2f8] sm:$0xff]  ;;  %v944_v26 = vld [vmem:[%s3171_s2 + $0x3f0] sm:$0xff] }
 0x109   : > { %v2937_v41 = vpop.eup %2080  ;;  %708 = vst [vmem:[%s2719_s17 + $0x20] sm:$0xff] %v2922_v35  ;;  %2100 = vtanh.f32 %v663_v32  ;;  %1959 = vmatprep.subr.bf16.mxu1 %v1958_v20  ;;  %v578_v42 = vpop.f32.mrb[14].mxu0  ;;  %1025 = vmatprep.mubr.f32.mxu0 %v811_v34  ;;  %v1938_v16 = vpack.c.bf16 %v911_v5, %v910_v4  ;;  %v1970_v21 = vpack.c.bf16 %v943_v11, %v942_v10  ;;  %v896_v34 = vld [vmem:[%s3171_s2 + $0x270] sm:$0xff] }
 0x10a   : > { %v2083_v49 = vpop.eup %2082  ;;  %710 = vst [vmem:[%s2719_s17 + $0x30] sm:$0xff] %v2937_v41  ;;  %2102 = vtanh.f32 %v578_v42  ;;  %v667_v50 = vpop.f32.mrb[14].mxu1  ;;  %1110 = vmatprep.mubr.f32.mxu1 %v813_v58  ;;  %1026 = vmatmul.mubr.f32.gmra.mrb[22].mxu0 %v810_v27  ;;  %v945_v27 = vld [vmem:[%s3171_s2 + $0x3f8] sm:$0xff]  ;;  %v1940_v29 = vpack.c.bf16 %v895_v18, %v894_v17  ;;  %v1972_v32 = vpack.c.bf16 %v927_v22, %v926_v19 }
 0x10b   : > { %v580_v51 = vpop.f32.mrb[15].mxu0  ;;  %v2085_v54 = vpop.eup %2084  ;;  %709 = vst [vmem:[%s2719_s17 + $0x28] sm:$0xff] %v2083_v49  ;;  %2104 = vtanh.f32 %v667_v50  ;;  %1929 = vmatpush3.bf16.msra.mxu0 %v1928_v33  ;;  %1111 = vmatmul.mubr.f32.gmra.mrb[22].mxu1 %v812_v7  ;;  %v791_v31 = vmul.f32 %v2083_v49, %v2726_v6  ;;  %v1942_v33 = vpack.c.bf16 %v913_v24, %v912_v23  ;;  %v897_v7 = vld [vmem:[%s3171_s2 + $0x278] sm:$0xff] }
 0x10c   : > { %v669_v56 = vpop.f32.mrb[15].mxu1  ;;  %v2962_v48 = vpop.eup %2086  ;;  %711 = vst [vmem:[%s2719_s17 + $0x38] sm:$0xff] %v2085_v54  ;;  %1961 = vmatpush3.bf16.msra.mxu1 %v1960_v36  ;;  %2106 = vtanh.f32 %v580_v51  ;;  %1931 = vmatprep.subr.bf16.mxu0 %v1930_v37  ;;  %v793_v59 = vmul.f32 %v2085_v54, %v2726_v6  ;;  %v1974_v58 = vpack.c.bf16 %v945_v27, %v944_v26  ;;  %v928_v37 = vld [vmem:[%s3171_s2 + $0x370] sm:$0xff] }
 0x10d   : > { %v2975_v1 = vpop.eup %2088  ;;  %716 = vst [vmem:[%s2719_s17 + $0x60] sm:$0xff] %v2962_v48  ;;  %2108 = vtanh.f32 %v669_v56  ;;  %1180 = vmatprep.mubr.f32.mxu0 %v791_v31  ;;  %1963 = vmatprep.subr.bf16.mxu1 %v1962_v44  ;;  %v1944_v42 = vpack.c.bf16 %v897_v7, %v896_v34  ;;  %v1976_v44 = vpack.c.bf16 %v929_v38, %v928_v37  ;;  %v1310_v31 = vld [vmem:[%s3172_s3] sm:$0xff] }
 0x10e   : > { %v2091_v9 = vpop.eup %2090  ;;  %718 = vst [vmem:[%s2719_s17 + $0x70] sm:$0xff] %v2975_v1  ;;  %1265 = vmatprep.mubr.f32.mxu1 %v793_v59  ;;  %v790_v45 = vmul.f32 %v2922_v35, %v2726_v6  ;;  %v792_v46 = vmul.f32 %v2937_v41, %v2726_v6  ;;  %v798_v50 = vmul.f32 %v2962_v48, %v2749_v15  ;;  %v1313_v59 = vld [vmem:[%s3172_s3 + $0x18] sm:$0xff] }
 0x10f   : > { %v2093_v55 = vpop.eup %2092  ;;  %717 = vst [vmem:[%s2719_s17 + $0x68] sm:$0xff] %v2091_v9  ;;  %1933 = vmatpush3.bf16.msra.mxu0 %v1932_v57  ;;  %v799_v47 = vmul.f32 %v2091_v9, %v2749_v15  ;;  %v800_v51 = vmul.f32 %v2975_v1, %v2749_v15  ;;  %v1312_v57 = vld [vmem:[%s3172_s3 + $0x10] sm:$0xff] }
 0x110   : > { %v2997_v13 = vpop.eup %2094  ;;  %719 = vst [vmem:[%s2719_s17 + $0x78] sm:$0xff] %v2093_v55  ;;  %1965 = vmatpush3.bf16.msra.mxu1 %v1964_v60  ;;  %1935 = vmatprep.subr.bf16.mxu0 %v1934_v61  ;;  %v801_v49 = vmul.f32 %v2093_v55, %v2749_v15  ;;  %v1314_v60 = vld [vmem:[%s3172_s3 + $0x20] sm:$0xff]  ;;  %v1315_v61 = vld [vmem:[%s3172_s3 + $0x28] sm:$0xff] }
 0x111   : > { %v2097_v20 = vpop.eup %2096  ;;  %724 = vst [vmem:[%s2719_s17 + $0xa0] sm:$0xff] %v2997_v13  ;;  %1967 = vmatprep.subr.bf16.mxu1 %v1966_v2  ;;  %v806_v6 = vmul.f32 %v2997_v13, %v2808_v43  ;;  %v1986_v62 = vpack.c.bf16 %v1315_v61, %v1314_v60 }
 0x112   : > { %v2099_v25 = vpop.eup %2098  ;;  %726 = vst [vmem:[%s2719_s17 + $0xb0] sm:$0xff] %v2097_v20  ;;  %v808_v41 = vmul.f32 %v2097_v20, %v2808_v43 }
 0x113   : > { %v2101_v28 = vpop.eup %2100  ;;  %725 = vst [vmem:[%s2719_s17 + $0xa8] sm:$0xff] %v2099_v25  ;;  %1937 = vmatpush3.bf16.msra.mxu0 %v1936_v12  ;;  %v807_v35 = vmul.f32 %v2099_v25, %v2808_v43 }
 0x114   : > { %v2103_v30 = vpop.eup %2102  ;;  %727 = vst [vmem:[%s2719_s17 + $0xb8] sm:$0xff] %v2101_v28  ;;  %1969 = vmatpush3.bf16.msra.mxu1 %v1968_v14  ;;  %1939 = vmatprep.subr.bf16.mxu0 %v1938_v16  ;;  %v809_v52 = vmul.f32 %v2101_v28, %v2808_v43  ;;  %v1311_v43 = vld [vmem:[%s3172_s3 + $0x8] sm:$0xff] }
 0x115   : > { %v2105_v36 = vpop.eup %2104  ;;  %732 = vst [vmem:[%s2719_s17 + $0xe0] sm:$0xff] %v2103_v30  ;;  %1971 = vmatprep.subr.bf16.mxu1 %v1970_v21  ;;  %v814_v15 = vmul.f32 %v2103_v30, %v2866_v8  ;;  %v1978_v48 = vpack.c.bf16 %v1311_v43, %v1310_v31  ;;  %v1316_v30 = vld [vmem:[%s3172_s3 + $0x30] sm:$0xff] }
 0x116   : > { %v2107_v39 = vpop.eup %2106  ;;  %734 = vst [vmem:[%s2719_s17 + $0xf0] sm:$0xff] %v2105_v36  ;;  %v816_v56 = vmul.f32 %v2105_v36, %v2866_v8 }
 0x117   : > { %v2109_v40 = vpop.eup %2108  ;;  %733 = vst [vmem:[%s2719_s17 + $0xe8] sm:$0xff] %v2107_v39  ;;  %1941 = vmatpush3.bf16.msra.mxu0 %v1940_v29  ;;  %v815_v53 = vmul.f32 %v2107_v39, %v2866_v8 }
 0x118   : > { %735 = vst [vmem:[%s2719_s17 + $0xf8] sm:$0xff] %v2109_v40  ;;  %1973 = vmatpush3.bf16.msra.mxu1 %v1972_v32  ;;  %1943 = vmatprep.subr.bf16.mxu0 %v1942_v33  ;;  %v817_v54 = vmul.f32 %v2109_v40, %v2866_v8  ;;  %v1982_v8 = vpack.c.bf16 %v1313_v59, %v1312_v57  ;;  %v1317_v32 = vld [vmem:[%s3172_s3 + $0x38] sm:$0xff]  ;;  %v2127_v57 = vld [vmem:[%s2348_s26 + $0x8] sm:$0xff] }
 0x119   : > { %1975 = vmatprep.subr.bf16.mxu1 %v1974_v58  ;;  %v1990_v33 = vpack.c.bf16 %v1317_v32, %v1316_v30 }
 0x11b   : > { %1945 = vmatpush3.bf16.msra.mxu0 %v1944_v42 }
 0x11c   : > { %1977 = vmatpush3.bf16.msra.mxu1 %v1976_v44  ;;  %1979 = vmatprep.subr.bf16.mxu0 %v1978_v48 }
 0x11d   : > { %1994 = vmatprep.subr.bf16.mxu1 %v1978_v48 }
 0x11e   : > { %1181 = vmatmul.mubr.f32.vlgmr.msra.gmra.mrb[24].mxu0 %v790_v45 }
 0x11f   : > { %1266 = vmatmul.mubr.f32.vlgmr.msra.gmra.mrb[24].mxu1 %v792_v46  ;;  %1185 = vmatprep.mubr.f32.mxu0 %v799_v47 }
 0x120   : > { %1270 = vmatprep.mubr.f32.mxu1 %v801_v49  ;;  %1981 = vmatpush3.bf16.msra.mxu0 %v1978_v48 }
 0x121   : > { %1998 = vmatpush3.bf16.msra.mxu1 %v1978_v48  ;;  %1983 = vmatprep.subr.bf16.mxu0 %v1982_v8 }
 0x122   : > { %1186 = vmatmul.mubr.f32.gmra.mrb[26].mxu0 %v798_v50  ;;  %1995 = vmatprep.subr.bf16.mxu1 %v1982_v8 }
 0x123   : > { %1271 = vmatmul.mubr.f32.gmra.mrb[26].mxu1 %v800_v51  ;;  %1190 = vmatprep.mubr.f32.mxu0 %v807_v35  ;;  %v2126_v35 = vld [vmem:[%s2348_s26] sm:$0xff] }
 0x124   : > { %1275 = vmatprep.mubr.f32.mxu1 %v809_v52  ;;  %1985 = vmatpush3.bf16.msra.mxu0 %v1982_v8 }
 0x125   : > { %1999 = vmatpush3.bf16.msra.mxu1 %v1982_v8  ;;  %1987 = vmatprep.subr.bf16.mxu0 %v1986_v62 }
 0x126   : > { %1191 = vmatmul.mubr.f32.gmra.mrb[28].mxu0 %v806_v6  ;;  %1996 = vmatprep.subr.bf16.mxu1 %v1986_v62 }
 0x127   : > { %1276 = vmatmul.mubr.f32.gmra.mrb[28].mxu1 %v808_v41  ;;  %1195 = vmatprep.mubr.f32.mxu0 %v815_v53 }
 0x128   : > { %1280 = vmatprep.mubr.f32.mxu1 %v817_v54  ;;  %1989 = vmatpush3.bf16.msra.mxu0 %v1986_v62 }
 0x129   : > { %2000 = vmatpush3.bf16.msra.mxu1 %v1986_v62  ;;  %1991 = vmatprep.subr.bf16.mxu0 %v1990_v33 }
 0x12a   : > { %1196 = vmatmul.mubr.f32.gmra.mrb[30].mxu0 %v814_v15  ;;  %1997 = vmatprep.subr.bf16.mxu1 %v1990_v33 }
 0x12b   : > { %1281 = vmatmul.mubr.f32.gmra.mrb[30].mxu1 %v816_v56 }
 0x12c   : > { %1993 = vmatpush3.bf16.msra.mxu0 %v1990_v33 }
 0x12d   : > { %2001 = vmatpush3.bf16.msra.mxu1 %v1990_v33 }
 0x1d1   : > { %v1640_v63 = vpop.f32.mrb[16].mxu0 }
 0x1d2   : > { %v1684_v0 = vpop.f32.mrb[16].mxu1  ;;  %v1641_v1 = vpop.f32.mrb[17].mxu0 }
 0x1d3   : > { %v1642_v2 = vadd.f32 %v1641_v1, %v1640_v63  ;;  %v1685_v3 = vpop.f32.mrb[17].mxu1  ;;  %v2128_v1 = vld [vmem:[%s2348_s26 + $0x10] sm:$0xff] }
 0x1d4   : > { %v1686_v4 = vadd.f32 %v1685_v3, %v1684_v0 }
 0x1d5   : > { %v1643_v5 = vpop.f32.mrb[18].mxu0 }
 0x1d6   : > { %v1098_v9 = vadd.f32 %v1686_v4, %v1642_v2  ;;  %v1687_v10 = vpop.f32.mrb[18].mxu1  ;;  %v1644_v11 = vpop.f32.mrb[19].mxu0  ;;  %v2129_v4 = vld [vmem:[%s2348_s26 + $0x18] sm:$0xff]  ;;  %s1607_s26 = sshll.u32 %s2256_s25, 12  ;;  %s2198_s25 = smov [#allocation2]  }
 0x1d7   : > { %v1645_v55 = vadd.f32 %v1644_v11, %v1643_v5  ;;  %v1688_v12 = vpop.f32.mrb[19].mxu1  ;;  %s3109_s12 = scalar_lea.hbm %s3175_s6, %s1607_s26 }
 0x1d8   : > { %v1689_v13 = vadd.f32 %v1688_v12, %v1687_v10 }
 0x1d9   : > { %v1646_v14 = vpop.f32.mrb[20].mxu0 }
 0x1da   : > { %v1103_v16 = vadd.f32 %v1689_v13, %v1645_v55  ;;  %v1690_v17 = vpop.f32.mrb[20].mxu1  ;;  %v1647_v18 = vpop.f32.mrb[21].mxu0 }
 0x1db   : > { %v1648_v19 = vadd.f32 %v1647_v18, %v1646_v14  ;;  %v1691_v20 = vpop.f32.mrb[21].mxu1 }
 0x1dc   : > { %v1692_v21 = vadd.f32 %v1691_v20, %v1690_v17 }
 0x1dd   : > { %v1649_v22 = vpop.f32.mrb[22].mxu0 }
 0x1de   : > { %v1108_v23 = vadd.f32 %v1692_v21, %v1648_v19  ;;  %v1693_v24 = vpop.f32.mrb[22].mxu1  ;;  %v1650_v25 = vpop.f32.mrb[23].mxu0 }
 0x1df   : > { %v1651_v26 = vadd.f32 %v1650_v25, %v1649_v22  ;;  %v1694_v27 = vpop.f32.mrb[23].mxu1 }
 0x1e0   : > { %v1695_v28 = vadd.f32 %v1694_v27, %v1693_v24 }
 0x1e2   : > { %v1113_v29 = vadd.f32 %v1695_v28, %v1651_v26 }
 0x1f1   : > { %v1728_v34 = vpop.f32.mrb[24].mxu0 }
 0x1f2   : > { %v1772_v7 = vpop.f32.mrb[24].mxu1  ;;  %v1729_v36 = vpop.f32.mrb[25].mxu0 }
 0x1f3   : > { %v1730_v58 = vadd.f32 %v1729_v36, %v1728_v34  ;;  %v1773_v37 = vpop.f32.mrb[25].mxu1 }
 0x1f4   : > { %v1774_v38 = vadd.f32 %v1773_v37, %v1772_v7 }
 0x1f5   : > { %v1183_v39 = vadd.f32 %v1730_v58, %v1098_v9  ;;  %v1731_v40 = vpop.f32.mrb[26].mxu0 }
 0x1f6   : > { %v1775_v42 = vpop.f32.mrb[26].mxu1  ;;  %v1732_v44 = vpop.f32.mrb[27].mxu0 }
 0x1f7   : > { %v1268_v45 = vadd.f32 %v1774_v38, %v1183_v39  ;;  %v1733_v46 = vadd.f32 %v1732_v44, %v1731_v40  ;;  %v1776_v47 = vpop.f32.mrb[27].mxu1 }
 0x1f8   : > { %v1777_v49 = vadd.f32 %v1776_v47, %v1775_v42 }
 0x1f9   : > { %v1188_v50 = vadd.f32 %v1733_v46, %v1103_v16  ;;  %v1734_v51 = vpop.f32.mrb[28].mxu0  ;;  %v1286_v52 = vmul.f32 %v2126_v35, %v1268_v45 }
 0x1fa   : > { %v1778_v6 = vpop.f32.mrb[28].mxu1  ;;  %v1735_v41 = vpop.f32.mrb[29].mxu0 }
 0x1fb   : > { %v1273_v53 = vadd.f32 %v1777_v49, %v1188_v50  ;;  %v1736_v54 = vadd.f32 %v1735_v41, %v1734_v51  ;;  %v1779_v15 = vpop.f32.mrb[29].mxu1  ;;  %1294 = vrot.lane.b32.xlu0 %v1286_v52, %s2195_s28 }
 0x1fc   : > { %v1780_v56 = vadd.f32 %v1779_v15, %v1778_v6 }
 0x1fd   : > { %v1193_v31 = vadd.f32 %v1736_v54, %v1108_v23  ;;  %v1737_v43 = vpop.f32.mrb[30].mxu0  ;;  %v1287_v48 = vmul.f32 %v2127_v57, %v1273_v53 }
 0x1fe   : > { %v1781_v59 = vpop.f32.mrb[30].mxu1  ;;  %v1738_v8 = vpop.f32.mrb[31].mxu0 }
 0x1ff   : > { %v1278_v60 = vadd.f32 %v1780_v56, %v1193_v31  ;;  %v1739_v61 = vadd.f32 %v1738_v8, %v1737_v43  ;;  %v1782_v62 = vpop.f32.mrb[31].mxu1  ;;  %1296 = vrot.lane.b32.xlu1 %v1287_v48, %s2195_s28 }
 0x200   : > { %v1783_v63 = vadd.f32 %v1782_v62, %v1781_v59 }
 0x201   : > { %v1198_v0 = vadd.f32 %v1739_v61, %v1113_v29  ;;  %v1288_v2 = vmul.f32 %v2128_v1, %v1278_v60 }
 0x203   : > { %v1283_v3 = vadd.f32 %v1783_v63, %v1198_v0  ;;  %1298 = vrot.lane.b32.xlu0 %v1288_v2, %s2195_s28 }
 0x205   : > { %v1289_v5 = vmul.f32 %v2129_v4, %v1283_v3 }
 0x207   : > { %1300 = vrot.lane.b32.xlu1 %v1289_v5, %s2195_s28  ;;  %s1483_s28 = sshll.u32 %s2719_s17, 4  ;;  %s2134_s17 = sshll.u32 %s2198_s25, 4  ;;  %s3111_s28 = int_to_ptr.vmem [resolvable:$true] %s1483_s28  ;;  %s2135_s17 = int_to_ptr.vmem [resolvable:$false] %s2134_s17 }
 0x208   : > { %s2130_s9 = scalar_lea.vmem %s3111_s28, 4096  ;;  %s2136_s20 = scalar_lea.vmem %s2135_s17, 8192 }
 0x209   : > { %p2131_p11 = scmp.ne.s32.totalorder %s3111_s28, %s2130_s9  ;;  %p2137_p0 = scmp.lt.s32.totalorder %s3111_s28, %s2135_s17 }
 0x20a   : > { %p2138_p1 = scmp.lt.s32.totalorder %s2136_s20, %s2130_s9 }
 0x20b   : > { %p2132_p12 = pnand %p2131_p11, %p2273_p5 }
 0x20c   : > { %p2139_p2 = por %p2138_p1, %p2137_p0 }
 0x20d   : > { %p2133_p13 = pneg %p2132_p12 }
 0x20f   : > { %p2140_p3 = pnand %p2139_p2, %p2133_p13 }
 0x26d   : > { %v1295_v9 = vpop.permute.xlu0 %1294 }
 0x26e   : > { %v1306_v10 = vsel %vm303_vm0, %v2126_v35, %v1295_v9 }
 0x26f   : > { %1812 = vmatprep.mubr.msk.f32.mxu0 %vm776_vm1, %v1306_v10 }
 0x271   : > { %v1297_v11 = vpop.permute.xlu1 %1296 }
 0x272   : > { %v1307_v55 = vsel %vm303_vm0, %v2127_v57, %v1297_v11 }
 0x273   : > { %1813 = vmatmul.mubr.msk.f32.vlgmr.msra.gmra.mrb[32].mxu0 %vm776_vm1, %v1307_v55 }
 0x275   : > { %v1299_v12 = vpop.permute.xlu0 %1298 }
 0x276   : > { %v1308_v13 = vsel %vm303_vm0, %v2128_v1, %v1299_v12 }
 0x277   : > { %1815 = vmatprep.mubr.msk.f32.mxu1 %vm776_vm1, %v1308_v13 }
 0x279   : > { %v1301_v14 = vpop.permute.xlu1 %1300 }
 0x27a   : > { %v1309_v16 = vsel %vm303_vm0, %v2129_v4, %v1301_v14 }
 0x27b   : > { %1816 = vmatmul.mubr.msk.f32.vlgmr.msra.gmra.mrb[32].mxu1 %vm776_vm1, %v1309_v16 }
 0x27c   : > { %2143 = shalt.err (!%p2140_p3)
}
 0x27d   : > { %s2144_s10 = scalar_lea.hbm %s3109_s12, 4096  ;;  %s2148_s11 = scalar_lea.hbm %s3175_s6, 8192 }
 0x27e   : > { %p2145_p4 = scmp.ne.s32.totalorder %s3109_s12, %s2144_s10  ;;  %p2149_p9 = scmp.lt.u32.totalorder %s3109_s12, %s3175_s6 }
 0x27f   : > { %p2150_p10 = scmp.lt.u32.totalorder %s2148_s11, %s2144_s10  ;;  %p2152_p12 = scmp.lt.u32.totalorder %s2144_s10, %s3109_s12 }
 0x280   : > { %p2146_p7 = pnand %p2145_p4, %p2273_p5 }
 0x281   : > { %p2151_p11 = por %p2150_p10, %p2149_p9 }
 0x282   : > { %p2147_p8 = pneg %p2146_p7 }
 0x283   : > { %p2153_p13 = por %p2152_p12, %p2151_p11 }
 0x285   : > { %p2154_p0 = pnand %p2153_p13, %p2147_p8 }
 0x287   : > { %2157 = shalt.err (!%p2154_p0)
}
 0x288   : > { %s2199_s18 = smov 1024   ;;  %s3180_s19 = smov 64   ;;  %v1595_v17 = vld [vmem:[%s3173_s4] ss:$0 sm:$0xff]  ;;  %vm1454_vm3 = vcmask 130048  }
 0x289   : > { %2002 = dma.vmem_to_hbm [thread:$0]  (%p2273_p5), %s3111_s28, 4096, %s3109_s12, %s3115_s29, %s2199_s18, %s2199_s18, %s3180_s19  }
 0x28a   : > { %s3181_s7 = sshll.u32 %s3187_s15, 3 }
 0x28b   : > { %s264_s29 = scalar_lea.vmem %s3174_s5, %s3181_s7 }
 0x346   : > { %v1814_v18 = vpop.f32.mrb[32].mxu0 }
 0x347   : > { %v1409_v19 = vadd.f32 %v1814_v18, %v1595_v17  ;;  %v1403_v20 = vpop.f32.mrb[33].mxu0 }
 0x348   : > { %v1404_v21 = vadd.f32 %v1595_v17, %v1403_v20 }
 0x349   : > { %v1432_v22 = vmul.f32 1.442695, %v1409_v19  ;;  %v1423_v24 = vmul.f32 0.5, %v1409_v19  ;;  %vm1447_vm5 = vcmp.gt.f32.partialorder %v1409_v19, 0.0 }
 0x34a   : > { %v1430_v23 = vmul.f32 1.442695, %v1404_v21  ;;  %v1422_v25 = vmul.f32 0.5, %v1404_v21  ;;  %vm1446_vm4 = vcmp.gt.f32.partialorder %v1404_v21, 0.0 }
 0x34b   : > { %2110 = vpow2.f32 %v1432_v22 }
 0x34c   : > { %2112 = vpow2.f32 %v1430_v23 }
 0x34d   : > { %2114 = vtanh.f32 %v1423_v24 }
 0x34e   : > { %v1817_v26 = vpop.f32.mrb[32].mxu1  ;;  %2116 = vtanh.f32 %v1422_v25 }
 0x34f   : > { %v1419_v27 = vadd.f32 %v1817_v26, %v1595_v17  ;;  %v1413_v28 = vpop.f32.mrb[33].mxu1 }
 0x350   : > { %v1414_v29 = vadd.f32 %v1595_v17, %v1413_v28 }
 0x351   : > { %v1436_v30 = vmul.f32 1.442695, %v1419_v27  ;;  %v1425_v33 = vmul.f32 0.5, %v1419_v27  ;;  %vm1449_vm7 = vcmp.gt.f32.partialorder %v1419_v27, 0.0 }
 0x352   : > { %v1434_v32 = vmul.f32 1.442695, %v1414_v29  ;;  %v1424_v34 = vmul.f32 0.5, %v1414_v29  ;;  %vm1448_vm6 = vcmp.gt.f32.partialorder %v1414_v29, 0.0 }
 0x353   : > { %2118 = vpow2.f32 %v1436_v30 }
 0x354   : > { %2120 = vpow2.f32 %v1434_v32 }
 0x355   : > { %v2111_v7 = vpop.eup %2110  ;;  %2122 = vtanh.f32 %v1425_v33 }
 0x356   : > { %v1439_v36 = vadd.f32 1.0, %v2111_v7  ;;  %v2113_v58 = vpop.eup %2112  ;;  %2124 = vtanh.f32 %v1424_v34 }
 0x357   : > { %v2115_v37 = vpop.eup %2114  ;;  %v1438_v38 = vadd.f32 1.0, %v2113_v58 }
 0x358   : > { %v2117_v39 = vpop.eup %2116  ;;  %v1443_v40 = vmul.f32 %v2115_v37, %v1439_v36 }
 0x359   : > { %v1442_v42 = vmul.f32 %v2117_v39, %v1438_v38 }
 0x35a   : > { %v1451_v46 = vsel %vm1447_vm5, %v1409_v19, %v1443_v40 }
 0x35b   : > { %v1450_v44 = vsel %vm1446_vm4, %v1404_v21, %v1442_v42  ;;  %1456 = vst.msk [vmem:[%s264_s29 + $0x8] sm:$0xff] %vm1454_vm3, %v1451_v46 }
 0x35c   : > { %1455 = vst.msk [vmem:[%s264_s29] sm:$0xff] %vm1454_vm3, %v1450_v44 }
 0x35d   : > { %v2119_v45 = vpop.eup %2118 }
 0x35e   : > { %v1441_v47 = vadd.f32 1.0, %v2119_v45  ;;  %v2121_v49 = vpop.eup %2120 }
 0x35f   : > { %v2123_v50 = vpop.eup %2122  ;;  %v1440_v51 = vadd.f32 1.0, %v2121_v49 }
 0x360   : > { %v2125_v35 = vpop.eup %2124  ;;  %v1445_v52 = vmul.f32 %v2123_v50, %v1441_v47 }
 0x361   : > { %v1444_v6 = vmul.f32 %v2125_v35, %v1440_v51 }
 0x362   : > { %v1453_v53 = vsel %vm1449_vm7, %v1419_v27, %v1445_v52 }
 0x363   : > { %v1452_v41 = vsel %vm1448_vm6, %v1414_v29, %v1444_v6  ;;  %1458 = vst.msk [vmem:[%s264_s29 + $0x18] sm:$0xff] %vm1454_vm3, %v1453_v53 }
 0x364   : > { %1457 = vst.msk [vmem:[%s264_s29 + $0x10] sm:$0xff] %vm1454_vm3, %v1452_v41 }
 0x365 PF: > { %p2008_p5 = scmp.ge.s32.totalorder %s2192_s24, 2  ;;  %s1506_s15 = sand.u32 1, %s2180_s21  }
 0x366   : > { %s1507_s17 = scalar_lea.sflag [#allocation3], %s1506_s15 }
 0x367   : > { %p2005_p1 = pnand %p2008_p5, %p2277_p6 }
 0x369   : > { %2175 = dma.done.wait (!%p2005_p1), %s1507_s17, 4096  }
 0x36a   : > { %2177 = vsyncadd (!%p2005_p1), %s1507_s17, 4294963200  ;;  %p17_p2 = scmp.ge.s32.totalorder %s2260_s27, 4   ;;  %s3182_s21 = smov %s2184_s22 }
 0x36b   : > { %s3183_s22 = smov %s2188_s23  ;;  %s3184_s23 = smov %s2271_s30 }
 0x36c   : > { %s3185_s24 = smov %s2260_s27  ;;  %19 = sbr.rel (!%p17_p2) target bundleno = 3 (0x3), region = 87 }
 0x373   :  { %1512 = vsyncpa [#allocation3], 1 }
 0x374   :  { %1514 = vsyncpa [#allocation3 + $0x1], 1 }

</bundles_post_ra>
